<compile_context>
chip_gen: v7x
topology: tpu7x:2x2x1
jax: 0.10.0
libtpu: 0.0.40
codegen_flags: <defaults>
</compile_context>

<pallas_src>
import jax
import jax.numpy as jnp
from jax.experimental import pallas as pl
from jax.experimental.pallas import tpu as pltpu


def _ffn_kernel(x_ref, w1_ref, b1_ref, w2_ref, b2_ref, o_ref):
    # x_ref:  (1, T*C, HW)   one image, channels on sublanes, H*W on lanes
    # w1_ref: (T*F, T*C)     block-diagonal grouped 1x1 conv #1
    # b1_ref: (T*F, 1)
    # w2_ref: (T*C, T*F)     block-diagonal grouped 1x1 conv #2
    # b2_ref: (T*C, 1)
    # o_ref:  (1, T*C, HW)
    x = x_ref[0]                                                   # (T*C, HW)
    h = jnp.dot(w1_ref[...], x, preferred_element_type=jnp.float32)  # (T*F, HW)
    h = jnp.maximum(h + b1_ref[...], 0.0)                          # bias + ReLU
    y = jnp.dot(w2_ref[...], h, preferred_element_type=jnp.float32)  # (T*C, HW)
    o_ref[0] = (y + b2_ref[...]).astype(o_ref.dtype)


def positionwise_cnn_forward(x, w1, b1, w2, b2):
    """x:  (B, T, C, H, W) float32, T == groups, C == d_channel.
    w1: (d_ff*T, C, 1, 1)   PyTorch grouped Conv2d weight of self.w_1
    b1: (d_ff*T,)
    w2: (C*T, d_ff, 1, 1)   PyTorch grouped Conv2d weight of self.w_2
    b2: (C*T,)
    Returns (B, T, C, H, W), matching the PyTorch module output (eval mode)."""
    B, T, C, H, W = x.shape
    F = w1.shape[0] // T
    HW, TC, TF = H * W, T * C, T * F

    # --- tiny wrapper-side prep: block-diagonalize the grouped 1x1 convs ---
    eye_t = jnp.eye(T, dtype=jnp.float32)
    w1_blk = w1[:, :, 0, 0].astype(jnp.float32).reshape(T, F, C)          # (T,F,C)
    w1_bd = (w1_blk[:, :, None, :] * eye_t[:, None, :, None]).reshape(TF, TC)
    w2_blk = w2[:, :, 0, 0].astype(jnp.float32).reshape(T, C, F)          # (T,C,F)
    w2_bd = (w2_blk[:, :, None, :] * eye_t[:, None, :, None]).reshape(TC, TF)
    b1c = b1.astype(jnp.float32).reshape(TF, 1)
    b2c = b2.astype(jnp.float32).reshape(TC, 1)

    # Pure reshape (no transpose, no pad): NCHW row-major is already the
    # lane-dense (channels, H*W) layout the kernel wants.
    x_flat = x.reshape(B, TC, HW)

    out = pl.pallas_call(
        _ffn_kernel,
        out_shape=jax.ShapeDtypeStruct((B, TC, HW), x.dtype),
        grid_spec=pltpu.PrefetchScalarGridSpec(
            num_scalar_prefetch=0,
            grid=(B,),
            in_specs=[
                pl.BlockSpec((1, TC, HW), lambda b: (b, 0, 0)),
                pl.BlockSpec((TF, TC), lambda b: (0, 0)),
                pl.BlockSpec((TF, 1), lambda b: (0, 0)),
                pl.BlockSpec((TC, TF), lambda b: (0, 0)),
                pl.BlockSpec((TC, 1), lambda b: (0, 0)),
            ],
            out_specs=pl.BlockSpec((1, TC, HW), lambda b: (b, 0, 0)),
        ),
        compiler_params=pltpu.CompilerParams(
            dimension_semantics=("parallel",)),
    )(x_flat, w1_bd, b1c, w2_bd, b2c)

    return out.reshape(B, T, C, H, W)


def _reference(x, w1, b1, w2, b2):
    """Pure-JAX reference mirroring the PyTorch grouped-conv FFN (eval mode)."""
    B, T, C, H, W = x.shape
    F = w1.shape[0] // T
    xf = x.reshape(B, T, C, H * W).astype(jnp.float32)
    w1b = w1[:, :, 0, 0].reshape(T, F, C).astype(jnp.float32)
    w2b = w2[:, :, 0, 0].reshape(T, C, F).astype(jnp.float32)
    h = jnp.einsum('tfc,btcx->btfx', w1b, xf) + b1.reshape(1, T, F, 1)
    h = jnp.maximum(h, 0.0)
    y = jnp.einsum('tcf,btfx->btcx', w2b, h) + b2.reshape(1, T, C, 1)
    return y.reshape(B, T, C, H, W)


if __name__ == "__main__":
    # Small deterministic example consistent with the module:
    # groups=T=6, d_channel=4, d_ff=32, batch=2, spatial 16x16.
    B, T, C, F, H, W = 2, 6, 4, 32, 16, 16

    key = jax.random.PRNGKey(0)
    kx, kw1, kb1, kw2, kb2 = jax.random.split(key, 5)
    x = jax.random.normal(kx, (B, T, C, H, W), dtype=jnp.float32)
    w1 = 0.1 * jax.random.normal(kw1, (F * T, C, 1, 1), dtype=jnp.float32)
    b1 = 0.05 * jax.random.normal(kb1, (F * T,), dtype=jnp.float32)
    w2 = 0.1 * jax.random.normal(kw2, (C * T, F, 1, 1), dtype=jnp.float32)
    b2 = 0.05 * jax.random.normal(kb2, (C * T,), dtype=jnp.float32)

    out = jax.jit(positionwise_cnn_forward)(x, w1, b1, w2, b2)
    out = jax.block_until_ready(out)

    ref = _reference(x, w1, b1, w2, b2)
    assert out.shape == (B, T, C, H, W), out.shape
    assert jnp.allclose(out, ref, atol=1e-4, rtol=1e-4), "mismatch vs reference"

    print("KERNEL_OK")
</pallas_src>

<mosaic_0001>
module attributes {stable_mosaic.version = 11 : i64} {
  func.func @_ffn_kernel(%arg0: i32, %arg1: memref<1x24x256xf32, #tpu.memory_space<vmem>>, %arg2: memref<192x24xf32, #tpu.memory_space<vmem>>, %arg3: memref<192x1xf32, #tpu.memory_space<vmem>>, %arg4: memref<24x192xf32, #tpu.memory_space<vmem>>, %arg5: memref<24x1xf32, #tpu.memory_space<vmem>>, %arg6: memref<1x24x256xf32, #tpu.memory_space<vmem>>) attributes {dimension_semantics = [#tpu.dimension_semantics<parallel>], iteration_bounds = array<i64: 2>, scalar_prefetch = 0 : i64, scratch_operands = 0 : i64, tpu.core_type = #tpu.core_type<tc>, window_params = [{transform_indices = @transform_0, window_bounds = array<i64: 1, 24, 256>}, {pipeline_mode = #tpu.pipeline_mode<synchronous>, transform_indices = @transform_1, window_bounds = array<i64: 192, 24>}, {pipeline_mode = #tpu.pipeline_mode<synchronous>, transform_indices = @transform_2, window_bounds = array<i64: 192, 1>}, {pipeline_mode = #tpu.pipeline_mode<synchronous>, transform_indices = @transform_3, window_bounds = array<i64: 24, 192>}, {pipeline_mode = #tpu.pipeline_mode<synchronous>, transform_indices = @transform_4, window_bounds = array<i64: 24, 1>}, {transform_indices = @transform_5, window_bounds = array<i64: 1, 24, 256>}]} {
    %c0 = arith.constant 0 : index
    %c0_0 = arith.constant 0 : index
    %c0_1 = arith.constant 0 : index
    %0 = vector.load %arg1[%c0, %c0_0, %c0_1] : memref<1x24x256xf32, #tpu.memory_space<vmem>>, vector<1x24x256xf32>
    %1 = vector.shape_cast %0 : vector<1x24x256xf32> to vector<24x256xf32>
    %c0_2 = arith.constant 0 : index
    %c0_3 = arith.constant 0 : index
    %2 = vector.load %arg2[%c0_2, %c0_3] : memref<192x24xf32, #tpu.memory_space<vmem>>, vector<192x24xf32>
    %cst = arith.constant dense<0.000000e+00> : vector<192x256xf32>
    %3 = tpu.matmul %2, %1, %cst {dimension_numbers = #tpu.dot_dimension_numbers<[1], [0], [0], [1], [0, 0, 1, 1], [], []>} : vector<192x24xf32>, vector<24x256xf32>, vector<192x256xf32> -> vector<192x256xf32>
    %c0_4 = arith.constant 0 : index
    %c0_5 = arith.constant 0 : index
    %4 = vector.load %arg3[%c0_4, %c0_5] : memref<192x1xf32, #tpu.memory_space<vmem>>, vector<192x1xf32>
    %5 = vector.broadcast %4 : vector<192x1xf32> to vector<192x256xf32>
    %6 = arith.addf %3, %5 : vector<192x256xf32>
    %cst_6 = arith.constant 0.000000e+00 : f32
    %7 = vector.broadcast %cst_6 : f32 to vector<192x256xf32>
    %8 = arith.maximumf %6, %7 : vector<192x256xf32>
    %c0_7 = arith.constant 0 : index
    %c0_8 = arith.constant 0 : index
    %9 = vector.load %arg4[%c0_7, %c0_8] : memref<24x192xf32, #tpu.memory_space<vmem>>, vector<24x192xf32>
    %cst_9 = arith.constant dense<0.000000e+00> : vector<24x256xf32>
    %10 = tpu.matmul %9, %8, %cst_9 {dimension_numbers = #tpu.dot_dimension_numbers<[1], [0], [0], [1], [0, 0, 1, 1], [], []>} : vector<24x192xf32>, vector<192x256xf32>, vector<24x256xf32> -> vector<24x256xf32>
    %c0_10 = arith.constant 0 : index
    %c0_11 = arith.constant 0 : index
    %11 = vector.load %arg5[%c0_10, %c0_11] : memref<24x1xf32, #tpu.memory_space<vmem>>, vector<24x1xf32>
    %12 = vector.broadcast %11 : vector<24x1xf32> to vector<24x256xf32>
    %13 = arith.addf %10, %12 : vector<24x256xf32>
    %c0_12 = arith.constant 0 : index
    %c0_13 = arith.constant 0 : index
    %c0_14 = arith.constant 0 : index
    %14 = vector.load %arg6[%c0_12, %c0_13, %c0_14] : memref<1x24x256xf32, #tpu.memory_space<vmem>>, vector<1x24x256xf32>
    %15 = vector.shape_cast %14 : vector<1x24x256xf32> to vector<24x256xf32>
    %16 = vector.shape_cast %13 : vector<24x256xf32> to vector<1x24x256xf32>
    tpu.vector_store %arg6[%c0_12, %c0_13, %c0_14], %16 {strides = array<i32>} : memref<1x24x256xf32, #tpu.memory_space<vmem>>, vector<1x24x256xf32>,
    return
  }
  func.func @transform_0(%arg0: i32) -> (i32, i32, i32) {
    %c0_i32 = arith.constant 0 : i32
    %c0_i32_0 = arith.constant 0 : i32
    %c0_i32_1 = arith.constant 0 : i32
    return %arg0, %c0_i32, %c0_i32_0 : i32, i32, i32
  }
  func.func @transform_1(%arg0: i32) -> (i32, i32) {
    %c0_i32 = arith.constant 0 : i32
    %c0_i32_0 = arith.constant 0 : i32
    %c0_i32_1 = arith.constant 0 : i32
    return %c0_i32, %c0_i32_0 : i32, i32
  }
  func.func @transform_2(%arg0: i32) -> (i32, i32) {
    %c0_i32 = arith.constant 0 : i32
    %c0_i32_0 = arith.constant 0 : i32
    %c0_i32_1 = arith.constant 0 : i32
    return %c0_i32, %c0_i32_0 : i32, i32
  }
  func.func @transform_3(%arg0: i32) -> (i32, i32) {
    %c0_i32 = arith.constant 0 : i32
    %c0_i32_0 = arith.constant 0 : i32
    %c0_i32_1 = arith.constant 0 : i32
    return %c0_i32, %c0_i32_0 : i32, i32
  }
  func.func @transform_4(%arg0: i32) -> (i32, i32) {
    %c0_i32 = arith.constant 0 : i32
    %c0_i32_0 = arith.constant 0 : i32
    %c0_i32_1 = arith.constant 0 : i32
    return %c0_i32, %c0_i32_0 : i32, i32
  }
  func.func @transform_5(%arg0: i32) -> (i32, i32, i32) {
    %c0_i32 = arith.constant 0 : i32
    %c0_i32_0 = arith.constant 0 : i32
    %c0_i32_1 = arith.constant 0 : i32
    return %arg0, %c0_i32, %c0_i32_0 : i32, i32, i32
  }
}

</mosaic_0001>

<bundles_post_ra>
// kernel: mul.15
= control target key start
LH: loop header
LB: loop body
LE: loop exit
PB: predicated region body
PF: predicated region fallthrough
CT: control target
= control target key end

     0   :  { %vm11_vm0 = vcmask 261120   ;;  %s45_s12 = smov 32   ;;  %s46_s15 = smov 64   ;;  %s83_s0 = inlined_call_operand.vmem [shape: f32[192,4], index: 0, kind: input, shape index: {}]   ;;  %s84_s1 = inlined_call_operand.vmem [shape: f32[6,32,4], index: 1, kind: output, shape index: {}]  }
   0x1   :  { %v36_v0 = vld [vmem:[%s83_s0 + $0x4] sm:$0xf]  ;;  %v8_v1 = vld [vmem:[%s83_s0] sm:$0xf]  ;;  %s44_s0 = smov 96  }
   0x2   :  { %7 = vst [vmem:[#allocation0 + $0x8] sm:$0xf] %v36_v0  ;;  %9 = vst [vmem:[#allocation0] sm:$0xf] %v8_v1 }
   0x9   :  { %v18_v2 = vld.sshfl [vmem:[#allocation0] sm:$0xff pattern:$0xb3a29180]  }
   0xa   :  { %v14_v3 = vld [vmem:[#allocation0 + $0x8] sm:$0xf]   ;;  %19 = vrot.lane.b32.xlu0 %v18_v2, %s44_s0  ;;  %v30_v4 = vld [vmem:[#allocation0] sm:$0xf]  }
   0xb   :  { %37 = vst.msk [vmem:[%s84_s1 + $0x4] ss:$8 sm:$0xf] %vm11_vm0, %v14_v3   ;;  %v10_v5 = vld [vmem:[#allocation0] sm:$0xf]   ;;  %31 = vrot.lane.b32.xlu1 %v30_v4, %s45_s12 }
   0xc   :  { %v24_v6 = vld [vmem:[#allocation0] sm:$0xf]   ;;  %12 = vst.msk [vmem:[%s84_s1] ss:$8 sm:$0xf] %vm11_vm0, %v10_v5  }
   0xe   :  { %25 = vrot.lane.b32.xlu0 %v24_v6, %s46_s15 }
  0x7c   :  { %v20_v7 = vpop.permute.xlu0 %19  }
  0x7d   :  { %38 = vst.msk [vmem:[%s84_s1 + $0x1] ss:$4 sm:$0xff] %vm11_vm0, %v20_v7   ;;  %v32_v8 = vpop.permute.xlu1 %31  }
  0x7e   :  { %40 = vst.msk [vmem:[%s84_s1 + $0x3] ss:$8 sm:$0xf] %vm11_vm0, %v32_v8  }
  0x80   :  { %v26_v9 = vpop.permute.xlu0 %25  }
  0x81   :  { %39 = vst.msk [vmem:[%s84_s1 + $0x2] ss:$8 sm:$0xf] %vm11_vm0, %v26_v9  }

// kernel: positionwise_cnn_forward.1
= control target key start
LH: loop header
LB: loop body
LE: loop exit
PB: predicated region body
PF: predicated region fallthrough
CT: control target
= control target key end

     0   :  { %s1048_s18 = smov 0   ;;  %s1294_s0 = inlined_call_operand.vmem [shape: f32[2,24,256], index: 0, kind: input, shape index: {}]   ;;  %s1295_s1 = inlined_call_operand.vmem [shape: f32[192,24], index: 1, kind: input, shape index: {}]   ;;  %s1296_s2 = inlined_call_operand.vmem [shape: f32[192,1], index: 2, kind: input, shape index: {}]   ;;  %s1297_s3 = inlined_call_operand.vmem [shape: f32[24,192], index: 3, kind: input, shape index: {}]   ;;  %s1298_s4 = inlined_call_operand.vmem [shape: f32[24,1], index: 4, kind: input, shape index: {}]   ;;  %s1299_s5 = inlined_call_operand.vmem [shape: f32[2,24,256], index: 5, kind: output, shape index: {}]  }
   0x1 LB: > { %s907_s19 = sadd.s32 4294967295, %s1014_s18   ;;  %p911_p0 = scmp.ge.s32.totalorder %s1014_s18, 1  ;;  %s1014_s18 = sphi %s1048_s18, %s15_s18  }
   0x2   : > { %p187_p1 = scmp.lt.s32.totalorder %s1014_s18, 3 }
   0x4   : > { %p188_p2 = pnand %p911_p0, %p187_p1 }
   0x5   : > { %p215_p3 = scmp.lt.s32.totalorder (!%p188_p2), %s907_s19, 1  ;;  %v1016_v0 = vmov (!%p188_p2), 0.0   ;;  %v1017_v1 = vmov (!%p188_p2), 0   ;;  %v255_v2 = vld [vmem:[%s1296_s2] sm:$0xff] (!%p188_p2)  ;;  %v256_v10 = vld [vmem:[%s1296_s2 + $0x8] sm:$0xff] (!%p188_p2)  ;;  %v257_v11 = vld [vmem:[%s1296_s2 + $0x10] sm:$0xff] (!%p188_p2) }
   0x6   : > { %191 = sbr.rel (%p188_p2) target bundleno = 565 (0x235), region = 40  ;;  %536 = vmatprep.mubr.f32.mxu0 (!%p188_p2), %v1016_v0  ;;  %1006 = vset.pattern.permute.xlu0 (!%p188_p2), %v1017_v1  ;;  %v259_v13 = vld [vmem:[%s1296_s2 + $0x20] sm:$0xff] (!%p188_p2)  ;;  %vm399_vm0 = vcmask (!%p188_p2), 195584   ;;  %v258_v15 = vld [vmem:[%s1296_s2 + $0x18] sm:$0xff] (!%p188_p2)  ;;  %v261_v16 = vld [vmem:[%s1296_s2 + $0x30] sm:$0xff] (!%p188_p2)  ;;  %vm753_vm1 = vcmask (!%p188_p2), 523264  }
   0x7   : > { %1007 = vset.pattern.permute.xlu1 (!%p188_p2), %v1017_v1  ;;  %281 = vperm.xlu0 (!%p188_p2), %1006, %v255_v2   ;;  %v231_v14 = vld [vmem:[%s1295_s1] sm:$0xff] (!%p188_p2)  ;;  %v232_v17 = vld [vmem:[%s1295_s1 + $0x8] sm:$0xff] (!%p188_p2)  ;;  %v233_v20 = vld [vmem:[%s1295_s1 + $0x10] sm:$0xff] (!%p188_p2) }
   0x8   : > { %291 = vperm.xlu1 (!%p188_p2), %1007, %v257_v11   ;;  %v260_v18 = vld [vmem:[%s1296_s2 + $0x28] sm:$0xff] (!%p188_p2)  ;;  %v263_v19 = vld [vmem:[%s1296_s2 + $0x40] sm:$0xff] (!%p188_p2)  ;;  %v262_v21 = vld [vmem:[%s1296_s2 + $0x38] sm:$0xff] (!%p188_p2) }
   0x9   : > { %v265_v22 = vld [vmem:[%s1296_s2 + $0x50] sm:$0xff] (!%p188_p2)  ;;  %v234_v23 = vld [vmem:[%s1295_s1 + $0x18] sm:$0xff] (!%p188_p2)  ;;  %v264_v24 = vld [vmem:[%s1296_s2 + $0x48] sm:$0xff] (!%p188_p2) }
   0xa   : > { %v267_v25 = vld [vmem:[%s1296_s2 + $0x60] sm:$0xff] (!%p188_p2)  ;;  %v266_v27 = vld [vmem:[%s1296_s2 + $0x58] sm:$0xff] (!%p188_p2)  ;;  %v269_v28 = vld [vmem:[%s1296_s2 + $0x70] sm:$0xff] (!%p188_p2) }
   0xb   : > { %286 = vperm.xlu0 (!%p188_p2), %1006, %v256_v10   ;;  %v235_v26 = vld [vmem:[%s1295_s1 + $0x20] sm:$0xff] (!%p188_p2)  ;;  %v236_v29 = vld [vmem:[%s1295_s1 + $0x28] sm:$0xff] (!%p188_p2)  ;;  %v237_v32 = vld [vmem:[%s1295_s1 + $0x30] sm:$0xff] (!%p188_p2) }
   0xc   : > { %296 = vperm.xlu1 (!%p188_p2), %1007, %v258_v15   ;;  %v268_v30 = vld [vmem:[%s1296_s2 + $0x68] sm:$0xff] (!%p188_p2)  ;;  %v271_v31 = vld [vmem:[%s1296_s2 + $0x80] sm:$0xff] (!%p188_p2)  ;;  %v270_v33 = vld [vmem:[%s1296_s2 + $0x78] sm:$0xff] (!%p188_p2) }
   0xd   : > { %s1301_s19 = smov (!%p215_p3, %s907_s19), 1  ;;  %v273_v34 = vld [vmem:[%s1296_s2 + $0x90] sm:$0xff]  ;;  %v238_v35 = vld [vmem:[%s1295_s1 + $0x38] sm:$0xff]  ;;  %v272_v36 = vld [vmem:[%s1296_s2 + $0x88] sm:$0xff] }
   0xe   : > { %s995_s20 = smul.u32 48, %s1301_s19  ;;  %v275_v37 = vld [vmem:[%s1296_s2 + $0xa0] sm:$0xff]  ;;  %v274_v39 = vld [vmem:[%s1296_s2 + $0x98] sm:$0xff]  ;;  %v277_v40 = vld [vmem:[%s1296_s2 + $0xb0] sm:$0xff] }
   0xf   : > { %301 = vperm.xlu0 %1006, %v259_v13   ;;  %v239_v38 = vld [vmem:[%s1295_s1 + $0x40] sm:$0xff]  ;;  %v240_v41 = vld [vmem:[%s1295_s1 + $0x48] sm:$0xff]  ;;  %v241_v44 = vld [vmem:[%s1295_s1 + $0x50] sm:$0xff] }
  0x10   : > { %s219_s23 = scalar_lea.vmem %s1294_s0, %s995_s20  ;;  %306 = vperm.xlu1 %1007, %v260_v18   ;;  %v276_v42 = vld [vmem:[%s1296_s2 + $0xa8] sm:$0xff]  ;;  %v735_v43 = vld [vmem:[%s1298_s4] sm:$0xff]  ;;  %v278_v45 = vld [vmem:[%s1296_s2 + $0xb8] sm:$0xff]  ;;  %s224_s30 = scalar_lea.vmem %s1299_s5, %s995_s20 }
  0x11   : > { %v226_v3 = vld [vmem:[%s219_s23 + $0x8] sm:$0xff]  ;;  %v228_v4 = vld [vmem:[%s219_s23 + $0x18] sm:$0xff]  ;;  %v225_v5 = vld [vmem:[%s219_s23] sm:$0xff] }
  0x12   : > { %v943_v6 = vpack.c.bf16 %v228_v4, %v226_v3  ;;  %v227_v7 = vld [vmem:[%s219_s23 + $0x10] sm:$0xff]  ;;  %v230_v9 = vld [vmem:[%s219_s23 + $0x28] sm:$0xff]  ;;  %v229_v12 = vld [vmem:[%s219_s23 + $0x20] sm:$0xff] }
  0x13   : > { %v945_v8 = vpack.c.bf16 %v227_v7, %v225_v5  ;;  %311 = vperm.xlu0 %1006, %v261_v16   ;;  %v737_v46 = vld [vmem:[%s1298_s4 + $0x10] sm:$0xff]  ;;  %v242_v47 = vld [vmem:[%s1295_s1 + $0x58] sm:$0xff]  ;;  %v736_v48 = vld [vmem:[%s1298_s4 + $0x8] sm:$0xff] }
  0x14   : > { %944 = vmatprep.subr.bf16.mxu0 %v943_v6  ;;  %316 = vperm.xlu1 %1007, %v262_v21   ;;  %v243_v49 = vld [vmem:[%s1295_s1 + $0x60] sm:$0xff]  ;;  %v244_v50 = vld [vmem:[%s1295_s1 + $0x68] sm:$0xff]  ;;  %v245_v51 = vld [vmem:[%s1295_s1 + $0x70] sm:$0xff] }
  0x15   : > { %946 = vmatpush1.bf16.msra.mxu0 %v945_v8  ;;  %v246_v52 = vld [vmem:[%s1295_s1 + $0x78] sm:$0xff]  ;;  %v247_v53 = vld [vmem:[%s1295_s1 + $0x80] sm:$0xff]  ;;  %v248_v54 = vld [vmem:[%s1295_s1 + $0x88] sm:$0xff] }
  0x16   : > { %476 = vmatprep.subr.mxu0 %v230_v9  ;;  %v249_v55 = vld [vmem:[%s1295_s1 + $0x90] sm:$0xff]  ;;  %v250_v56 = vld [vmem:[%s1295_s1 + $0x98] sm:$0xff]  ;;  %v251_v57 = vld [vmem:[%s1295_s1 + $0xa0] sm:$0xff] }
  0x17   : > { %321 = vperm.xlu0 %1006, %v263_v19   ;;  %v252_v58 = vld [vmem:[%s1295_s1 + $0xa8] sm:$0xff]  ;;  %v253_v59 = vld [vmem:[%s1295_s1 + $0xb0] sm:$0xff]  ;;  %v254_v60 = vld [vmem:[%s1295_s1 + $0xb8] sm:$0xff] }
  0x18   : > { %326 = vperm.xlu1 %1007, %v264_v24   ;;  %v730_v61 = vld [vmem:[%s1297_s3 + $0x8] sm:$0xff] }
  0x19   : > { %477 = vmatpush1.msra.mxu0 %v229_v12  ;;  %938 = vmatprep.mubr.msk.f32.mxu1 %vm753_vm1, %v730_v61 }
  0x1a   : > { %914 = vmatmul.mubr.msk.f32.vlgmr.msra.gmra.mrb[0].mxu0 %vm399_vm0, %v231_v14 }
  0x1b   : > { %542 = vmatprep.mubr.f32.mxu0 %v1016_v0  ;;  %331 = vperm.xlu0 %1006, %v265_v22  }
  0x1c   : > { %336 = vperm.xlu1 %1007, %v266_v27  }
  0x1e   : > { %915 = vmatmul.mubr.msk.f32.gmra.mrb[2].mxu0 %vm399_vm0, %v232_v17 }
  0x1f   : > { %548 = vmatprep.mubr.f32.mxu0 %v1016_v0  ;;  %341 = vperm.xlu0 %1006, %v267_v25  }
  0x20   : > { %346 = vperm.xlu1 %1007, %v268_v30  }
  0x22   : > { %916 = vmatmul.mubr.msk.f32.gmra.mrb[4].mxu0 %vm399_vm0, %v233_v20 }
  0x23   : > { %554 = vmatprep.mubr.f32.mxu0 %v1016_v0  ;;  %351 = vperm.xlu0 %1006, %v269_v28  }
  0x24   : > { %356 = vperm.xlu1 %1007, %v270_v33  }
  0x26   : > { %917 = vmatmul.mubr.msk.f32.gmra.mrb[6].mxu0 %vm399_vm0, %v234_v23 }
  0x27   : > { %560 = vmatprep.mubr.f32.mxu0 %v1016_v0  ;;  %361 = vperm.xlu0 %1006, %v271_v31  }
  0x28   : > { %366 = vperm.xlu1 %1007, %v272_v36  }
  0x2a   : > { %918 = vmatmul.mubr.msk.f32.gmra.mrb[8].mxu0 %vm399_vm0, %v235_v26 }
  0x2b   : > { %566 = vmatprep.mubr.f32.mxu0 %v1016_v0  ;;  %371 = vperm.xlu0 %1006, %v273_v34  }
  0x2c   : > { %376 = vperm.xlu1 %1007, %v274_v39  }
  0x2e   : > { %919 = vmatmul.mubr.msk.f32.gmra.mrb[10].mxu0 %vm399_vm0, %v236_v29 }
  0x2f   : > { %572 = vmatprep.mubr.f32.mxu0 %v1016_v0  ;;  %381 = vperm.xlu0 %1006, %v275_v37  }
  0x30   : > { %386 = vperm.xlu1 %1007, %v276_v42  }
  0x32   : > { %920 = vmatmul.mubr.msk.f32.gmra.mrb[12].mxu0 %vm399_vm0, %v237_v32 }
  0x33   : > { %578 = vmatprep.mubr.f32.mxu0 %v1016_v0  ;;  %391 = vperm.xlu0 %1006, %v277_v40  }
  0x34   : > { %396 = vperm.xlu1 %1007, %v278_v45  }
  0x36   : > { %921 = vmatmul.mubr.msk.f32.gmra.mrb[14].mxu0 %vm399_vm0, %v238_v35 }
  0x37   : > { %584 = vmatprep.mubr.f32.mxu0 %v1016_v0  ;;  %740 = vperm.xlu0 %1006, %v735_v43  }
  0x38   : > { %745 = vperm.xlu1 %1007, %v736_v48  }
  0x3a   : > { %922 = vmatmul.mubr.msk.f32.gmra.mrb[16].mxu0 %vm399_vm0, %v239_v38 }
  0x3b   : > { %590 = vmatprep.mubr.f32.mxu0 %v1016_v0  ;;  %750 = vperm.xlu0 %1006, %v737_v46  }
  0x3e   : > { %923 = vmatmul.mubr.msk.f32.gmra.mrb[18].mxu0 %vm399_vm0, %v240_v41 }
  0x3f   : > { %596 = vmatprep.mubr.f32.mxu0 %v1016_v0 }
  0x42   : > { %924 = vmatmul.mubr.msk.f32.gmra.mrb[20].mxu0 %vm399_vm0, %v241_v44 }
  0x43   : > { %602 = vmatprep.mubr.f32.mxu0 %v1016_v0 }
  0x46   : > { %925 = vmatmul.mubr.msk.f32.gmra.mrb[22].mxu0 %vm399_vm0, %v242_v47 }
  0x47   : > { %608 = vmatprep.mubr.f32.mxu0 %v1016_v0 }
  0x4a   : > { %926 = vmatmul.mubr.msk.f32.gmra.mrb[24].mxu0 %vm399_vm0, %v243_v49 }
  0x4b   : > { %614 = vmatprep.mubr.f32.mxu0 %v1016_v0 }
  0x4e   : > { %927 = vmatmul.mubr.msk.f32.gmra.mrb[26].mxu0 %vm399_vm0, %v244_v50 }
  0x4f   : > { %620 = vmatprep.mubr.f32.mxu0 %v1016_v0 }
  0x52   : > { %928 = vmatmul.mubr.msk.f32.gmra.mrb[28].mxu0 %vm399_vm0, %v245_v51 }
  0x53   : > { %626 = vmatprep.mubr.f32.mxu0 %v1016_v0 }
  0x56   : > { %929 = vmatmul.mubr.msk.f32.gmra.mrb[30].mxu0 %vm399_vm0, %v246_v52 }
  0x57   : > { %632 = vmatprep.mubr.f32.mxu0 %v1016_v0 }
  0x5a   : > { %930 = vmatmul.mubr.msk.f32.gmra.mrb[32].mxu0 %vm399_vm0, %v247_v53 }
  0x5b   : > { %638 = vmatprep.mubr.f32.mxu0 %v1016_v0 }
  0x5e   : > { %931 = vmatmul.mubr.msk.f32.gmra.mrb[34].mxu0 %vm399_vm0, %v248_v54 }
  0x5f   : > { %644 = vmatprep.mubr.f32.mxu0 %v1016_v0 }
  0x62   : > { %932 = vmatmul.mubr.msk.f32.gmra.mrb[36].mxu0 %vm399_vm0, %v249_v55 }
  0x63   : > { %650 = vmatprep.mubr.f32.mxu0 %v1016_v0 }
  0x66   : > { %933 = vmatmul.mubr.msk.f32.gmra.mrb[38].mxu0 %vm399_vm0, %v250_v56 }
  0x67   : > { %656 = vmatprep.mubr.f32.mxu0 %v1016_v0 }
  0x6a   : > { %934 = vmatmul.mubr.msk.f32.gmra.mrb[40].mxu0 %vm399_vm0, %v251_v57 }
  0x6b   : > { %662 = vmatprep.mubr.f32.mxu0 %v1016_v0 }
  0x6e   : > { %935 = vmatmul.mubr.msk.f32.gmra.mrb[42].mxu0 %vm399_vm0, %v252_v58 }
  0x6f   : > { %668 = vmatprep.mubr.f32.mxu0 %v1016_v0 }
  0x72   : > { %936 = vmatmul.mubr.msk.f32.gmra.mrb[44].mxu0 %vm399_vm0, %v253_v59 }
  0x73   : > { %674 = vmatprep.mubr.f32.mxu0 %v1016_v0 }
  0x76   : > { %937 = vmatmul.mubr.msk.f32.gmra.mrb[46].mxu0 %vm399_vm0, %v254_v60 }
  0x86   : > { %v282_v62 = vpop.permute.xlu0 %281 }
  0x87   : > { %v292_v7 = vpop.permute.xlu1 %291 }
  0x8a   : > { %v287_v3 = vpop.permute.xlu0 %286 }
  0x8b   : > { %v297_v18 = vpop.permute.xlu1 %296 }
  0x8e   : > { %v302_v31 = vpop.permute.xlu0 %301 }
  0x8f   : > { %v307_v34 = vpop.permute.xlu1 %306 }
  0x92   : > { %v312_v47 = vpop.permute.xlu0 %311 }
  0x93   : > { %v317_v50 = vpop.permute.xlu1 %316 }
  0xed   : > { %v538_v63 = vpop.f32.mrb[0].mxu0 }
  0xee   : > { %v540_v1 = vpop.f32.mrb[1].mxu0  ;;  %v539_v2 = vadd.f32 %v538_v63, %v282_v62  ;;  %v322_v63 = vpop.permute.xlu0 %321 }
  0xef   : > { %v541_v4 = vadd.f32 %v540_v1, %v282_v62 }
  0xf0   : > { %v681_v9 = vmax.f32 %v539_v2, 0.0 }
  0xf1   : > { %v544_v0 = vpop.f32.mrb[2].mxu0  ;;  %v682_v11 = vmax.f32 %v541_v4, 0.0 }
  0xf2   : > { %v545_v5 = vadd.f32 %v544_v0, %v287_v3  ;;  %v546_v6 = vpop.f32.mrb[3].mxu0 }
  0xf3   : > { %v547_v8 = vadd.f32 %v546_v6, %v287_v3  ;;  %v327_v3 = vpop.permute.xlu1 %326 }
  0xf4   : > { %v683_v10 = vmax.f32 %v545_v5, 0.0 }
  0xf5   : > { %v684_v12 = vmax.f32 %v547_v8, 0.0  ;;  %v550_v13 = vpop.f32.mrb[4].mxu0 }
  0xf6   : > { %v552_v14 = vpop.f32.mrb[5].mxu0  ;;  %v949_v15 = vpack.c.bf16 %v683_v10, %v681_v9  ;;  %v551_v17 = vadd.f32 %v550_v13, %v292_v7 }
  0xf7   : > { %v947_v16 = vpack.c.bf16 %v684_v12, %v682_v11  ;;  %v553_v19 = vadd.f32 %v552_v14, %v292_v7 }
  0xf8   : > { %v685_v24 = vmax.f32 %v551_v17, 0.0 }
  0xf9   : > { %v556_v20 = vpop.f32.mrb[6].mxu0  ;;  %948 = vmatprep.subr.bf16.mxu1 %v947_v16  ;;  %v686_v26 = vmax.f32 %v553_v19, 0.0 }
  0xfa   : > { %v557_v21 = vadd.f32 %v556_v20, %v297_v18  ;;  %v558_v22 = vpop.f32.mrb[7].mxu0  ;;  %950 = vmatpush1.bf16.msra.mxu1 %v949_v15  ;;  %v332_v15 = vpop.permute.xlu0 %331 }
  0xfb   : > { %v559_v23 = vadd.f32 %v558_v22, %v297_v18  ;;  %v337_v18 = vpop.permute.xlu1 %336 }
  0xfc   : > { %v687_v25 = vmax.f32 %v557_v21, 0.0 }
  0xfd   : > { %v688_v27 = vmax.f32 %v559_v23, 0.0  ;;  %v562_v28 = vpop.f32.mrb[8].mxu0 }
  0xfe   : > { %v953_v29 = vpack.c.bf16 %v687_v25, %v685_v24  ;;  %v564_v30 = vpop.f32.mrb[9].mxu0  ;;  %v563_v33 = vadd.f32 %v562_v28, %v302_v31 }
  0xff   : > { %v951_v32 = vpack.c.bf16 %v688_v27, %v686_v26  ;;  %v565_v35 = vadd.f32 %v564_v30, %v302_v31  ;;  %v342_v31 = vpop.permute.xlu0 %341 }
 0x100   : > { %v689_v40 = vmax.f32 %v563_v33, 0.0 }
 0x101   : > { %v568_v36 = vpop.f32.mrb[10].mxu0  ;;  %952 = vmatprep.subr.bf16.mxu1 %v951_v32  ;;  %v690_v42 = vmax.f32 %v565_v35, 0.0 }
 0x102   : > { %v569_v37 = vadd.f32 %v568_v36, %v307_v34  ;;  %v570_v38 = vpop.f32.mrb[11].mxu0  ;;  %954 = vmatpush1.bf16.msra.mxu1 %v953_v29 }
 0x103   : > { %v571_v39 = vadd.f32 %v570_v38, %v307_v34  ;;  %v347_v34 = vpop.permute.xlu1 %346 }
 0x104   : > { %v691_v41 = vmax.f32 %v569_v37, 0.0 }
 0x105   : > { %v692_v43 = vmax.f32 %v571_v39, 0.0  ;;  %v574_v44 = vpop.f32.mrb[12].mxu0 }
 0x106   : > { %v957_v45 = vpack.c.bf16 %v691_v41, %v689_v40  ;;  %v576_v46 = vpop.f32.mrb[13].mxu0  ;;  %v575_v49 = vadd.f32 %v574_v44, %v312_v47 }
 0x107   : > { %v955_v48 = vpack.c.bf16 %v692_v43, %v690_v42  ;;  %v577_v51 = vadd.f32 %v576_v46, %v312_v47  ;;  %v352_v47 = vpop.permute.xlu0 %351 }
 0x108   : > { %v693_v56 = vmax.f32 %v575_v49, 0.0 }
 0x109   : > { %v580_v52 = vpop.f32.mrb[14].mxu0  ;;  %956 = vmatprep.subr.bf16.mxu1 %v955_v48  ;;  %v694_v58 = vmax.f32 %v577_v51, 0.0 }
 0x10a   : > { %v581_v53 = vadd.f32 %v580_v52, %v317_v50  ;;  %v582_v54 = vpop.f32.mrb[15].mxu0  ;;  %958 = vmatpush1.bf16.msra.mxu1 %v957_v45 }
 0x10b   : > { %v583_v55 = vadd.f32 %v582_v54, %v317_v50  ;;  %v357_v50 = vpop.permute.xlu1 %356 }
 0x10c   : > { %v695_v57 = vmax.f32 %v581_v53, 0.0 }
 0x10d   : > { %v696_v59 = vmax.f32 %v583_v55, 0.0  ;;  %v586_v60 = vpop.f32.mrb[16].mxu0 }
 0x10e   : > { %v961_v61 = vpack.c.bf16 %v695_v57, %v693_v56  ;;  %v588_v62 = vpop.f32.mrb[17].mxu0  ;;  %v587_v2 = vadd.f32 %v586_v60, %v322_v63 }
 0x10f   : > { %v959_v1 = vpack.c.bf16 %v696_v59, %v694_v58  ;;  %v589_v4 = vadd.f32 %v588_v62, %v322_v63  ;;  %v362_v63 = vpop.permute.xlu0 %361 }
 0x110   : > { %v697_v8 = vmax.f32 %v587_v2, 0.0 }
 0x111   : > { %v592_v0 = vpop.f32.mrb[18].mxu0  ;;  %960 = vmatprep.subr.bf16.mxu1 %v959_v1  ;;  %v698_v10 = vmax.f32 %v589_v4, 0.0 }
 0x112   : > { %v593_v5 = vadd.f32 %v592_v0, %v327_v3  ;;  %v594_v6 = vpop.f32.mrb[19].mxu0  ;;  %962 = vmatpush1.bf16.msra.mxu1 %v961_v61 }
 0x113   : > { %v595_v7 = vadd.f32 %v594_v6, %v327_v3  ;;  %v367_v3 = vpop.permute.xlu1 %366 }
 0x114   : > { %v699_v9 = vmax.f32 %v593_v5, 0.0 }
 0x115   : > { %v700_v11 = vmax.f32 %v595_v7, 0.0  ;;  %v598_v12 = vpop.f32.mrb[20].mxu0 }
 0x116   : > { %v965_v13 = vpack.c.bf16 %v699_v9, %v697_v8  ;;  %v600_v14 = vpop.f32.mrb[21].mxu0  ;;  %v599_v17 = vadd.f32 %v598_v12, %v332_v15 }
 0x117   : > { %v963_v16 = vpack.c.bf16 %v700_v11, %v698_v10  ;;  %v601_v19 = vadd.f32 %v600_v14, %v332_v15  ;;  %v372_v15 = vpop.permute.xlu0 %371 }
 0x118   : > { %v701_v24 = vmax.f32 %v599_v17, 0.0 }
 0x119   : > { %v604_v20 = vpop.f32.mrb[22].mxu0  ;;  %964 = vmatprep.subr.bf16.mxu1 %v963_v16  ;;  %v702_v26 = vmax.f32 %v601_v19, 0.0 }
 0x11a   : > { %v605_v21 = vadd.f32 %v604_v20, %v337_v18  ;;  %v606_v22 = vpop.f32.mrb[23].mxu0  ;;  %966 = vmatpush1.bf16.msra.mxu1 %v965_v13 }
 0x11b   : > { %v607_v23 = vadd.f32 %v606_v22, %v337_v18  ;;  %v377_v18 = vpop.permute.xlu1 %376 }
 0x11c   : > { %v703_v25 = vmax.f32 %v605_v21, 0.0 }
 0x11d   : > { %v704_v27 = vmax.f32 %v607_v23, 0.0  ;;  %v610_v28 = vpop.f32.mrb[24].mxu0 }
 0x11e   : > { %v969_v29 = vpack.c.bf16 %v703_v25, %v701_v24  ;;  %v612_v30 = vpop.f32.mrb[25].mxu0  ;;  %v611_v33 = vadd.f32 %v610_v28, %v342_v31 }
 0x11f   : > { %v967_v32 = vpack.c.bf16 %v704_v27, %v702_v26  ;;  %v613_v35 = vadd.f32 %v612_v30, %v342_v31  ;;  %v382_v31 = vpop.permute.xlu0 %381 }
 0x120   : > { %v705_v40 = vmax.f32 %v611_v33, 0.0 }
 0x121   : > { %v616_v36 = vpop.f32.mrb[26].mxu0  ;;  %968 = vmatprep.subr.bf16.mxu1 %v967_v32  ;;  %v706_v42 = vmax.f32 %v613_v35, 0.0 }
 0x122   : > { %v617_v37 = vadd.f32 %v616_v36, %v347_v34  ;;  %v618_v38 = vpop.f32.mrb[27].mxu0  ;;  %970 = vmatpush1.bf16.msra.mxu1 %v969_v29 }
 0x123   : > { %v619_v39 = vadd.f32 %v618_v38, %v347_v34  ;;  %v387_v34 = vpop.permute.xlu1 %386 }
 0x124   : > { %v707_v41 = vmax.f32 %v617_v37, 0.0 }
 0x125   : > { %v708_v43 = vmax.f32 %v619_v39, 0.0  ;;  %v622_v44 = vpop.f32.mrb[28].mxu0 }
 0x126   : > { %v973_v45 = vpack.c.bf16 %v707_v41, %v705_v40  ;;  %v624_v46 = vpop.f32.mrb[29].mxu0  ;;  %v623_v49 = vadd.f32 %v622_v44, %v352_v47 }
 0x127   : > { %v971_v48 = vpack.c.bf16 %v708_v43, %v706_v42  ;;  %v625_v51 = vadd.f32 %v624_v46, %v352_v47  ;;  %v392_v47 = vpop.permute.xlu0 %391 }
 0x128   : > { %v709_v56 = vmax.f32 %v623_v49, 0.0 }
 0x129   : > { %v628_v52 = vpop.f32.mrb[30].mxu0  ;;  %972 = vmatprep.subr.bf16.mxu1 %v971_v48  ;;  %v710_v58 = vmax.f32 %v625_v51, 0.0 }
 0x12a   : > { %v629_v53 = vadd.f32 %v628_v52, %v357_v50  ;;  %v630_v54 = vpop.f32.mrb[31].mxu0  ;;  %974 = vmatpush1.bf16.msra.mxu1 %v973_v45 }
 0x12b   : > { %v631_v55 = vadd.f32 %v630_v54, %v357_v50  ;;  %v397_v50 = vpop.permute.xlu1 %396 }
 0x12c   : > { %v711_v57 = vmax.f32 %v629_v53, 0.0 }
 0x12d   : > { %v712_v59 = vmax.f32 %v631_v55, 0.0  ;;  %v634_v60 = vpop.f32.mrb[32].mxu0 }
 0x12e   : > { %v977_v61 = vpack.c.bf16 %v711_v57, %v709_v56  ;;  %v636_v62 = vpop.f32.mrb[33].mxu0  ;;  %v635_v2 = vadd.f32 %v634_v60, %v362_v63 }
 0x12f   : > { %v975_v1 = vpack.c.bf16 %v712_v59, %v710_v58  ;;  %v637_v4 = vadd.f32 %v636_v62, %v362_v63  ;;  %v729_v62 = vld [vmem:[%s1297_s3] sm:$0xff]  ;;  %v732_v63 = vld [vmem:[%s1297_s3 + $0x18] sm:$0xff] }
 0x130   : > { %v713_v8 = vmax.f32 %v635_v2, 0.0  ;;  %v734_v2 = vld [vmem:[%s1297_s3 + $0x28] sm:$0xff] }
 0x131   : > { %v640_v0 = vpop.f32.mrb[34].mxu0  ;;  %976 = vmatprep.subr.bf16.mxu1 %v975_v1  ;;  %v714_v10 = vmax.f32 %v637_v4, 0.0  ;;  %v731_v1 = vld [vmem:[%s1297_s3 + $0x10] sm:$0xff]  ;;  %v741_v4 = vpop.permute.xlu0 %740 }
 0x132   : > { %v641_v5 = vadd.f32 %v640_v0, %v367_v3  ;;  %v642_v6 = vpop.f32.mrb[35].mxu0  ;;  %978 = vmatpush1.bf16.msra.mxu1 %v977_v61 }
 0x133   : > { %v643_v7 = vadd.f32 %v642_v6, %v367_v3  ;;  %v733_v3 = vld [vmem:[%s1297_s3 + $0x20] sm:$0xff] }
 0x134   : > { %v715_v9 = vmax.f32 %v641_v5, 0.0 }
 0x135   : > { %v716_v11 = vmax.f32 %v643_v7, 0.0  ;;  %v646_v12 = vpop.f32.mrb[36].mxu0 }
 0x136   : > { %v981_v13 = vpack.c.bf16 %v715_v9, %v713_v8  ;;  %v648_v14 = vpop.f32.mrb[37].mxu0  ;;  %v647_v17 = vadd.f32 %v646_v12, %v372_v15  ;;  %v746_v8 = vpop.permute.xlu1 %745 }
 0x137   : > { %v979_v16 = vpack.c.bf16 %v716_v11, %v714_v10  ;;  %v649_v19 = vadd.f32 %v648_v14, %v372_v15 }
 0x138   : > { %v717_v24 = vmax.f32 %v647_v17, 0.0 }
 0x139   : > { %v652_v20 = vpop.f32.mrb[38].mxu0  ;;  %980 = vmatprep.subr.bf16.mxu1 %v979_v16  ;;  %v718_v26 = vmax.f32 %v649_v19, 0.0 }
 0x13a   : > { %v653_v21 = vadd.f32 %v652_v20, %v377_v18  ;;  %v654_v22 = vpop.f32.mrb[39].mxu0  ;;  %982 = vmatpush1.bf16.msra.mxu1 %v981_v13  ;;  %v751_v13 = vpop.permute.xlu0 %750 }
 0x13b   : > { %v655_v23 = vadd.f32 %v654_v22, %v377_v18 }
 0x13c   : > { %v719_v25 = vmax.f32 %v653_v21, 0.0 }
 0x13d   : > { %v720_v27 = vmax.f32 %v655_v23, 0.0  ;;  %v658_v28 = vpop.f32.mrb[40].mxu0 }
 0x13e   : > { %v985_v29 = vpack.c.bf16 %v719_v25, %v717_v24  ;;  %v660_v30 = vpop.f32.mrb[41].mxu0  ;;  %v659_v33 = vadd.f32 %v658_v28, %v382_v31 }
 0x13f   : > { %v983_v32 = vpack.c.bf16 %v720_v27, %v718_v26  ;;  %v661_v35 = vadd.f32 %v660_v30, %v382_v31 }
 0x140   : > { %v721_v40 = vmax.f32 %v659_v33, 0.0 }
 0x141   : > { %v664_v36 = vpop.f32.mrb[42].mxu0  ;;  %984 = vmatprep.subr.bf16.mxu1 %v983_v32  ;;  %v722_v42 = vmax.f32 %v661_v35, 0.0 }
 0x142   : > { %v665_v37 = vadd.f32 %v664_v36, %v387_v34  ;;  %v666_v38 = vpop.f32.mrb[43].mxu0  ;;  %986 = vmatpush1.bf16.msra.mxu1 %v985_v29 }
 0x143   : > { %v667_v39 = vadd.f32 %v666_v38, %v387_v34 }
 0x144   : > { %v723_v41 = vmax.f32 %v665_v37, 0.0 }
 0x145   : > { %v724_v43 = vmax.f32 %v667_v39, 0.0  ;;  %v670_v44 = vpop.f32.mrb[44].mxu0 }
 0x146   : > { %v989_v45 = vpack.c.bf16 %v723_v41, %v721_v40  ;;  %v672_v46 = vpop.f32.mrb[45].mxu0  ;;  %v671_v49 = vadd.f32 %v670_v44, %v392_v47 }
 0x147   : > { %v987_v48 = vpack.c.bf16 %v724_v43, %v722_v42  ;;  %v673_v51 = vadd.f32 %v672_v46, %v392_v47 }
 0x148   : > { %v725_v56 = vmax.f32 %v671_v49, 0.0 }
 0x149   : > { %v676_v52 = vpop.f32.mrb[46].mxu0  ;;  %988 = vmatprep.subr.bf16.mxu1 %v987_v48  ;;  %v726_v58 = vmax.f32 %v673_v51, 0.0 }
 0x14a   : > { %v677_v53 = vadd.f32 %v676_v52, %v397_v50  ;;  %v678_v54 = vpop.f32.mrb[47].mxu0  ;;  %990 = vmatpush1.bf16.msra.mxu1 %v989_v45 }
 0x14b   : > { %v679_v55 = vadd.f32 %v678_v54, %v397_v50 }
 0x14c   : > { %v727_v57 = vmax.f32 %v677_v53, 0.0 }
 0x14d   : > { %v728_v59 = vmax.f32 %v679_v55, 0.0 }
 0x14e   : > { %v993_v60 = vpack.c.bf16 %v727_v57, %v725_v56 }
 0x14f   : > { %v991_v61 = vpack.c.bf16 %v728_v59, %v726_v58 }
 0x151   : > { %992 = vmatprep.subr.bf16.mxu1 %v991_v61 }
 0x152   : > { %994 = vmatpush1.bf16.msra.mxu1 %v993_v60 }
 0x155   : > { %828 = vmatmul.mubr.f32.vlgmr.msra.gmra.mrb[0].mxu1 %v729_v62 }
 0x156   : > { %939 = vmatprep.mubr.msk.f32.mxu1 %vm753_vm1, %v732_v63 }
 0x159   : > { %834 = vmatmul.mubr.f32.gmra.mrb[2].mxu1 %v731_v1 }
 0x15a   : > { %940 = vmatprep.mubr.msk.f32.mxu1 %vm753_vm1, %v734_v2 }
 0x15d   : > { %840 = vmatmul.mubr.f32.gmra.mrb[4].mxu1 %v733_v3 }
 0x228   : > { %v829_v0 = vpop.f32.mrb[0].mxu1 }
 0x229   : > { %v830_v5 = vadd.f32 %v829_v0, %v741_v4  ;;  %v831_v6 = vpop.f32.mrb[1].mxu1 }
 0x22a   : > { %v832_v7 = vadd.f32 %v831_v6, %v741_v4 }
 0x22b   : > { %846 = vst [vmem:[%s224_s30] sm:$0xff] %v830_v5 }
 0x22c   : > { %847 = vst [vmem:[%s224_s30 + $0x8] sm:$0xff] %v832_v7  ;;  %v835_v9 = vpop.f32.mrb[2].mxu1 }
 0x22d   : > { %v836_v10 = vadd.f32 %v835_v9, %v746_v8  ;;  %v837_v11 = vpop.f32.mrb[3].mxu1 }
 0x22e   : > { %v838_v12 = vadd.f32 %v837_v11, %v746_v8 }
 0x22f   : > { %848 = vst [vmem:[%s224_s30 + $0x10] sm:$0xff] %v836_v10 }
 0x230   : > { %849 = vst [vmem:[%s224_s30 + $0x18] sm:$0xff] %v838_v12  ;;  %v841_v14 = vpop.f32.mrb[4].mxu1 }
 0x231   : > { %v842_v15 = vadd.f32 %v841_v14, %v751_v13  ;;  %v843_v16 = vpop.f32.mrb[5].mxu1 }
 0x232   : > { %v844_v17 = vadd.f32 %v843_v16, %v751_v13 }
 0x233   : > { %850 = vst [vmem:[%s224_s30 + $0x20] sm:$0xff] %v842_v15 }
 0x234   : > { %851 = vst [vmem:[%s224_s30 + $0x28] sm:$0xff] %v844_v17 }
 0x235 PF: > { %s15_s18 = sadd.s32 1, %s1014_s18  }
 0x236   : > { %p12_p4 = scmp.ge.s32.totalorder %s15_s18, 4  }
 0x238   :  { %14 = sbr.rel (!%p12_p4) target bundleno = 1 (0x1), region = 70 }

</bundles_post_ra>
